<compile_context>
chip_gen: v7x
topology: tpu7x:2x2x1
jax: 0.10.0
libtpu: 0.0.40
codegen_flags: <defaults>
</compile_context>

<pallas_src>
import math

import jax
import jax.numpy as jnp
from jax.experimental import pallas as pl
from jax.experimental.pallas import tpu as pltpu


def _cdiv(a, b):
    return -(-a // b)


def _round_up(n, m):
    return ((n + m - 1) // m) * m


# -----------------------------------------------------------------------------
# Kernels
# -----------------------------------------------------------------------------

def _plain_kernel(x_ref, freq_ref, phase_ref, o_ref):
    # x_ref: (TB, 1); freq_ref / phase_ref: (1, L); o_ref: (TB, L)
    # cos(t) == sin(t + pi/2): a single full-width store instead of two
    # half-width (lane-misaligned) sin / cos stores.
    o_ref[...] = jnp.sin(x_ref[...] * freq_ref[...] + phase_ref[...])


def _packed_kernel(x_ref, sel_ref, freq_ref, phase_ref, o_ref):
    # x_ref: (TB, G); sel_ref: (G, 128) 0/1 selection; freq/phase: (1, 128);
    # o_ref: (TB, 128).  G = 128 // in_dim logical rows are folded into one
    # 128-lane output row so every store is lane-dense.  The 0/1 selection
    # matmul (idle MXU, HIGHEST precision => exact) broadcasts x[r, g] across
    # its group of in_dim lanes; the freq multiply stays on the VPU in f32.
    xb = jnp.dot(x_ref[...], sel_ref[...],
                 preferred_element_type=jnp.float32,
                 precision=jax.lax.Precision.HIGHEST)
    o_ref[...] = jnp.sin(xb * freq_ref[...] + phase_ref[...])


# -----------------------------------------------------------------------------
# Wrapper
# -----------------------------------------------------------------------------

def _choose_rows_tile(n_rows, lanes, max_rows):
    # VMEM working set per grid step ~= 4x the output tile (double-buffered
    # output + arg / sin live intermediates).  Keep it well under the smallest
    # default scoped-VMEM budget (16 MiB on v5e, 32 MiB on v6e/v7x).
    budget = 12 * 1024 * 1024
    cap = max(8, budget // (4 * lanes * 4))
    tb = max(8, (min(max_rows, cap) // 8) * 8)
    # Ensure >= 2 grid steps when there is enough work so the "parallel" batch
    # axis can shard across both v7x TensorCores (no effect on v5e/v6e).
    if n_rows >= 16:
        tb = min(tb, _round_up(_cdiv(n_rows, 2), 8))
    if n_rows <= tb:
        return n_rows, 1            # single whole-array block (always legal)
    return tb, _cdiv(n_rows, tb)


def sinusoidal_embedding(x, in_dim, theta=10000, max_block_rows=512):
    """x: (B,) array of timesteps -> (B, in_dim) float32 embedding."""
    if in_dim % 2 != 0 or in_dim < 4:
        # half - 1 == 0 would divide by zero; odd in_dim is unsupported by the
        # reference module's concat convention.
        raise ValueError("in_dim must be an even integer >= 4")

    B = x.shape[0]
    half = in_dim // 2
    scale = math.log(float(theta)) / (half - 1)
    freq = jnp.exp(jnp.arange(half, dtype=jnp.float32) * jnp.float32(-scale))
    freq2 = jnp.concatenate([freq, freq])                              # (in_dim,)
    phase = jnp.concatenate(
        [jnp.zeros((half,), jnp.float32),
         jnp.full((half,), math.pi / 2, dtype=jnp.float32)])           # (in_dim,)

    xf = x.astype(jnp.float32)

    # Lane-dense packing: when in_dim < 128, fold G = 128 // in_dim embedding
    # rows into one 128-lane output row and reshape back in the wrapper.
    G = 128 // in_dim if (in_dim < 128 and 128 % in_dim == 0) else 1
    pack = (G > 1) and (B % G == 0)
    if not pack:
        G = 1
    lanes = G * in_dim
    rows = B // G

    if pack:
        x2 = xf.reshape(rows, G)
        # 0/1 selection matrix: sel[g, g*in_dim + j] = 1.
        sel = jnp.kron(jnp.eye(G, dtype=jnp.float32),
                       jnp.ones((1, in_dim), jnp.float32))             # (G, 128)
        freq_t = jnp.tile(freq2, G).reshape(1, lanes)
        phase_t = jnp.tile(phase, G).reshape(1, lanes)
    else:
        x2 = xf.reshape(rows, 1)
        freq_t = freq2.reshape(1, lanes)
        phase_t = phase.reshape(1, lanes)

    tb, grid = _choose_rows_tile(rows, lanes, max_block_rows)

    # Pad only the (tiny) input so every grid step reads in-bounds data; the
    # output keeps its true shape (a ragged final block's out-of-bounds writes
    # are masked by Pallas) -- no wrapper-side output slice / HBM recopy.
    rows_pad = tb * grid
    if rows_pad != rows:
        x2 = jnp.pad(x2, ((0, rows_pad - rows), (0, 0)))

    table_spec = pl.BlockSpec((1, lanes), lambda i: (0, 0))
    if pack:
        kernel = _packed_kernel
        in_specs = [pl.BlockSpec((tb, G), lambda i: (i, 0)),
                    pl.BlockSpec((G, lanes), lambda i: (0, 0)),
                    table_spec, table_spec]
        args = (x2, sel, freq_t, phase_t)
    else:
        kernel = _plain_kernel
        in_specs = [pl.BlockSpec((tb, 1), lambda i: (i, 0)),
                    table_spec, table_spec]
        args = (x2, freq_t, phase_t)

    out = pl.pallas_call(
        kernel,
        out_shape=jax.ShapeDtypeStruct((rows, lanes), jnp.float32),
        grid=(grid,),
        in_specs=in_specs,
        out_specs=pl.BlockSpec((tb, lanes), lambda i: (i, 0)),
        compiler_params=pltpu.CompilerParams(
            dimension_semantics=("parallel",),
            vmem_limit_bytes=32 * 1024 * 1024,
        ),
        cost_estimate=pl.CostEstimate(
            flops=3 * B * in_dim,
            transcendentals=B * in_dim,
            bytes_accessed=4 * B * in_dim + 4 * B + 3 * 4 * lanes,
        ),
    )(*args)

    return out.reshape(B, in_dim) if pack else out


# -----------------------------------------------------------------------------
# Reference + self-test
# -----------------------------------------------------------------------------

def _reference(x, in_dim, theta=10000):
    half = in_dim // 2
    emb = math.log(theta) / (half - 1)
    emb = jnp.exp(jnp.arange(half, dtype=jnp.float32) * -emb)
    emb = x.astype(jnp.float32)[:, None] * emb[None, :]
    return jnp.concatenate([jnp.sin(emb), jnp.cos(emb)], axis=-1)


if __name__ == "__main__":
    key = jax.random.PRNGKey(0)
    k1, k2 = jax.random.split(key)

    # Case 1: in_dim < 128 -> packed lane-dense path (4 logical rows per
    # 128-lane output row).  "Timesteps" are per-sample scalars.
    B1, D1 = 8, 32
    x1 = jax.random.uniform(k1, (B1,), dtype=jnp.float32) * 1000.0
    out1 = jax.block_until_ready(sinusoidal_embedding(x1, D1))
    ref1 = _reference(x1, D1)
    assert out1.shape == (B1, D1)
    assert jnp.allclose(out1, ref1, atol=1e-4, rtol=1e-4), "packed path mismatch"

    # Case 2: 128 % in_dim != 0 -> plain full-width path.
    B2, D2 = 10, 48
    x2 = jax.random.uniform(k2, (B2,), dtype=jnp.float32) * 1000.0
    out2 = jax.block_until_ready(sinusoidal_embedding(x2, D2))
    ref2 = _reference(x2, D2)
    assert out2.shape == (B2, D2)
    assert jnp.allclose(out2, ref2, atol=1e-4, rtol=1e-4), "plain path mismatch"

    print("KERNEL_OK")
</pallas_src>

<mosaic_0001>
module attributes {stable_mosaic.version = 11 : i64} {
  func.func @_packed_kernel(%arg0: i32, %arg1: memref<2x4xf32, #tpu.memory_space<vmem>>, %arg2: memref<4x128xf32, #tpu.memory_space<vmem>>, %arg3: memref<1x128xf32, #tpu.memory_space<vmem>>, %arg4: memref<1x128xf32, #tpu.memory_space<vmem>>, %arg5: memref<2x128xf32, #tpu.memory_space<vmem>>) attributes {dimension_semantics = [#tpu.dimension_semantics<parallel>], iteration_bounds = array<i64: 1>, scalar_prefetch = 0 : i64, scratch_operands = 0 : i64, tpu.core_type = #tpu.core_type<tc>, window_params = [{transform_indices = @transform_0, window_bounds = array<i64: 2, 4>}, {pipeline_mode = #tpu.pipeline_mode<synchronous>, transform_indices = @transform_1, window_bounds = array<i64: 4, 128>}, {pipeline_mode = #tpu.pipeline_mode<synchronous>, transform_indices = @transform_2, window_bounds = array<i64: 1, 128>}, {pipeline_mode = #tpu.pipeline_mode<synchronous>, transform_indices = @transform_3, window_bounds = array<i64: 1, 128>}, {transform_indices = @transform_4, window_bounds = array<i64: 2, 128>}]} {
    %c0 = arith.constant 0 : index
    %c0_0 = arith.constant 0 : index
    %0 = vector.load %arg1[%c0, %c0_0] : memref<2x4xf32, #tpu.memory_space<vmem>>, vector<2x4xf32>
    %c0_1 = arith.constant 0 : index
    %c0_2 = arith.constant 0 : index
    %1 = vector.load %arg2[%c0_1, %c0_2] : memref<4x128xf32, #tpu.memory_space<vmem>>, vector<4x128xf32>
    %cst = arith.constant dense<0.000000e+00> : vector<2x128xf32>
    %2 = tpu.matmul %0, %1, %cst {dimension_numbers = #tpu.dot_dimension_numbers<[1], [0], [0], [1], [0, 0, 1, 1], [], []>, precision = #tpu.contract_precision<fp32>} : vector<2x4xf32>, vector<4x128xf32>, vector<2x128xf32> -> vector<2x128xf32>
    %c0_3 = arith.constant 0 : index
    %c0_4 = arith.constant 0 : index
    %3 = vector.load %arg3[%c0_3, %c0_4] : memref<1x128xf32, #tpu.memory_space<vmem>>, vector<1x128xf32>
    %4 = vector.broadcast %3 : vector<1x128xf32> to vector<2x128xf32>
    %5 = arith.mulf %2, %4 : vector<2x128xf32>
    %c0_5 = arith.constant 0 : index
    %c0_6 = arith.constant 0 : index
    %6 = vector.load %arg4[%c0_5, %c0_6] : memref<1x128xf32, #tpu.memory_space<vmem>>, vector<1x128xf32>
    %7 = vector.broadcast %6 : vector<1x128xf32> to vector<2x128xf32>
    %8 = arith.addf %5, %7 : vector<2x128xf32>
    %9 = math.sin %8 : vector<2x128xf32>
    %c0_7 = arith.constant 0 : index
    %c0_8 = arith.constant 0 : index
    %10 = vector.load %arg5[%c0_7, %c0_8] : memref<2x128xf32, #tpu.memory_space<vmem>>, vector<2x128xf32>
    tpu.vector_store %arg5[%c0_7, %c0_8], %9 {strides = array<i32>} : memref<2x128xf32, #tpu.memory_space<vmem>>, vector<2x128xf32>,
    return
  }
  func.func @transform_0(%arg0: i32) -> (i32, i32) {
    %c0_i32 = arith.constant 0 : i32
    %c0_i32_0 = arith.constant 0 : i32
    return %arg0, %c0_i32 : i32, i32
  }
  func.func @transform_1(%arg0: i32) -> (i32, i32) {
    %c0_i32 = arith.constant 0 : i32
    %c0_i32_0 = arith.constant 0 : i32
    %c0_i32_1 = arith.constant 0 : i32
    return %c0_i32, %c0_i32_0 : i32, i32
  }
  func.func @transform_2(%arg0: i32) -> (i32, i32) {
    %c0_i32 = arith.constant 0 : i32
    %c0_i32_0 = arith.constant 0 : i32
    %c0_i32_1 = arith.constant 0 : i32
    return %c0_i32, %c0_i32_0 : i32, i32
  }
  func.func @transform_3(%arg0: i32) -> (i32, i32) {
    %c0_i32 = arith.constant 0 : i32
    %c0_i32_0 = arith.constant 0 : i32
    %c0_i32_1 = arith.constant 0 : i32
    return %c0_i32, %c0_i32_0 : i32, i32
  }
  func.func @transform_4(%arg0: i32) -> (i32, i32) {
    %c0_i32 = arith.constant 0 : i32
    %c0_i32_0 = arith.constant 0 : i32
    return %arg0, %c0_i32 : i32, i32
  }
}

</mosaic_0001>

<bundles_post_ra>
// kernel: tpu_custom_call.1
= control target key start
LH: loop header
LB: loop body
LE: loop exit
PB: predicated region body
PF: predicated region fallthrough
CT: control target
= control target key end

     0   :  { %9 = vsyncpa [#allocation3], 0  ;;  %s888_s0 = inlined_call_operand.hbm [shape: f32[2,4], index: 0, kind: input, shape index: {}]   ;;  %s889_s1 = inlined_call_operand.hbm [shape: f32[4,128], index: 1, kind: input, shape index: {}]   ;;  %s890_s2 = inlined_call_operand.vmem [shape: f32[1,128], index: 2, kind: input, shape index: {}]   ;;  %s891_s3 = inlined_call_operand.vmem [shape: f32[1,128], index: 3, kind: input, shape index: {}]   ;;  %s892_s4 = inlined_call_operand.hbm [shape: f32[2,128], index: 4, kind: output, shape index: {}]  }
   0x1   :  { %10 = vsyncpa [#allocation6], 0 }
   0x2   :  { %11 = vsyncpa [#allocation4], 0  ;;  %s783_s15 = smov [#allocation2]   ;;  %s784_s17 = smov [#allocation5]  }
   0x3   :  { %s18_s16 = sshll.u32 %s783_s15, 4  ;;  %s28_s18 = sshll.u32 %s784_s17, 4  ;;  %s19_s16 = int_to_ptr.vmem [resolvable:$true] %s18_s16  ;;  %s29_s18 = int_to_ptr.vmem [resolvable:$true] %s28_s18 }
   0x4   :  { %s711_s21 = scalar_lea.hbm %s888_s0, 32 }
   0x5   :  { %p712_p0 = scmp.ne.s32.totalorder %s888_s0, %s711_s21  ;;  %p715_p1 = scmp.lt.u32.totalorder %s711_s21, %s888_s0 }
   0x7   :  { %p717_p2 = pnand %p715_p1, %p712_p0 }
   0x9   :  { %720 = shalt.err (!%p717_p2)
}
   0xa   :  { %s721_s26 = scalar_lea.vmem %s19_s16, 32  ;;  %p726_p4 = scmp.lt.s32.totalorder %s19_s16, %s19_s16 }
   0xb   :  { %p722_p3 = scmp.ne.s32.totalorder %s19_s16, %s721_s26  ;;  %p727_p5 = scmp.lt.s32.totalorder %s721_s26, %s721_s26 }
   0xd   :  { %p728_p6 = por %p727_p5, %p726_p4 }
   0xf   :  { %p729_p7 = pnand %p728_p6, %p722_p3 }
  0x11   :  { %732 = shalt.err (!%p729_p7)
}
  0x12   :  { %21 = dma.hbm_to_vmem [thread:$0]  %s888_s0, 32, %s19_s16, [#allocation3]  }
  0x13   :  { %s733_s5 = scalar_lea.hbm %s889_s1, 64 }
  0x14   :  { %p734_p8 = scmp.ne.s32.totalorder %s889_s1, %s733_s5  ;;  %p737_p9 = scmp.lt.u32.totalorder %s733_s5, %s889_s1 }
  0x16   :  { %p739_p10 = pnand %p737_p9, %p734_p8 }
  0x18   :  { %742 = shalt.err (!%p739_p10)
}
  0x19   :  { %s743_s10 = scalar_lea.vmem %s29_s18, 64  ;;  %p748_p12 = scmp.lt.s32.totalorder %s29_s18, %s29_s18 }
  0x1a   :  { %p744_p11 = scmp.ne.s32.totalorder %s29_s18, %s743_s10  ;;  %p749_p13 = scmp.lt.s32.totalorder %s743_s10, %s743_s10 }
  0x1c   :  { %p750_p0 = por %p749_p13, %p748_p12 }
  0x1e   :  { %p751_p1 = pnand %p750_p0, %p744_p11 }
  0x20   :  { %754 = shalt.err (!%p751_p1)
}
  0x21   :  { %31 = dma.hbm_to_vmem [thread:$0]  %s889_s1, 64, %s29_s18, [#allocation6]  }
  0x22   :  { %777 = dma.done.wait [#allocation3], 32  }
  0x23   :  { %778 = vsyncadd [#allocation3], 4294967264 }
  0x24   :  { %779 = dma.done.wait [#allocation6], 64  }
  0x25   :  { %780 = vsyncadd [#allocation6], 4294967232  ;;  %v785_v0 = vmov 0.0   ;;  %vm786_vm0 = vmmov 0   ;;  %vm48_vm1 = vcmask 1043456   ;;  %vm44_vm2 = vcmask 31744  }
  0x26   :  { %668 = vmatprep.subr.mxu0 %v785_v0  ;;  %670 = vmatprep.mubr.msk.f32.mxu0 %vm786_vm0, %v785_v0  ;;  %v43_v1 = vld [vmem:[#allocation5] sm:$0xf]  ;;  %v42_v2 = vld [vmem:[#allocation2] sm:$0x3]  ;;  %v787_v34 = vmov 683565275  }
  0x27   :  { %653 = vmatprep.subr.mxu1 %v785_v0  ;;  %655 = vmatprep.mubr.msk.f32.mxu1 %vm786_vm0, %v785_v0  ;;  %v50_v3 = vsel %vm48_vm1, %v43_v1, 0  ;;  %v46_v4 = vsel %vm44_vm2, %v42_v2, 0  ;;  %v635_v18 = vld [vmem:[%s890_s2] ss:$0 sm:$0xff]  ;;  %v788_v36 = vmov 2475754826  }
  0x28   :  { %v53_v5 = vand.u32 4294901760, %v50_v3  ;;  %v118_v6 = vand.u32 4294901760, %v46_v4  ;;  %v636_v21 = vld [vmem:[%s891_s3] ss:$0 sm:$0xff]  ;;  %v789_v39 = vmov 2131351028  }
  0x29   :  { %v790_v42 = vmov 2102212464   ;;  %v791_v45 = vmov 920167782   ;;  %v792_v48 = vmov 1326507024  }
  0x2a   :  { %v130_v7 = vsub.f32 %v50_v3, %v53_v5  ;;  %669 = vmatpush3.msra.mxu0 %v53_v5  ;;  %v119_v8 = vsub.f32 %v46_v4, %v118_v6  ;;  %654 = vmatpush3.msra.mxu1 %v53_v5  ;;  %s793_s2 = smov [#allocation7]  }
  0x2b   :  { %658 = vmatprep.subr.mxu1 %v785_v0  ;;  %673 = vmatprep.subr.mxu0 %v785_v0  ;;  %s625_s3 = sshll.u32 %s793_s2, 4  ;;  %s626_s3 = int_to_ptr.vmem [resolvable:$true] %s625_s3 }
  0x2c   :  { %v120_v9 = vand.u32 4294901760, %v119_v8  ;;  %v131_v10 = vand.u32 4294901760, %v130_v7  ;;  %s755_s15 = scalar_lea.vmem %s626_s3, 32  ;;  %p760_p3 = scmp.lt.s32.totalorder %s626_s3, %s626_s3 }
  0x2d   :  { %p756_p2 = scmp.ne.s32.totalorder %s626_s3, %s755_s15  ;;  %p761_p4 = scmp.lt.s32.totalorder %s755_s15, %s755_s15 }
  0x2e   :  { %671 = vmatmul.mubr.f32.vlgmr.msra.gmra.mrb[0].mxu0 %v120_v9  ;;  %v121_v11 = vsub.f32 %v119_v8, %v120_v9  ;;  %v132_v12 = vsub.f32 %v130_v7, %v131_v10 }
  0x2f   :  { %674 = vmatpush3.msra.mxu0 %v131_v10  ;;  %675 = vmatprep.mubr.msk.f32.mxu0 %vm786_vm0, %v785_v0  ;;  %p762_p5 = por %p761_p4, %p760_p3 }
  0x30   :  { %v122_v13 = vand.u32 4294901760, %v121_v11  ;;  %v133_v14 = vand.u32 4294901760, %v132_v12  ;;  %678 = vmatprep.subr.mxu0 %v785_v0 }
  0x31   :  { %p763_p6 = pnand %p762_p5, %p756_p2 }
  0x32   :  { %656 = vmatmul.mubr.f32.vlgmr.msra.gmra.mrb[0].mxu1 %v122_v13 }
  0x33   :  { %659 = vmatpush3.msra.mxu1 %v133_v14  ;;  %660 = vmatprep.mubr.msk.f32.mxu1 %vm786_vm0, %v785_v0 }
  0x34   :  { %663 = vmatprep.subr.mxu1 %v785_v0 }
  0x36   :  { %676 = vmatmul.mubr.f32.vlgmr.msra.gmra.mrb[0].mxu0 %v118_v6 }
  0x37   :  { %679 = vmatpush3.msra.mxu0 %v53_v5  ;;  %680 = vmatprep.mubr.msk.f32.mxu0 %vm786_vm0, %v785_v0 }
  0x3a   :  { %661 = vmatmul.mubr.f32.vlgmr.msra.gmra.mrb[0].mxu1 %v118_v6 }
  0x3b   :  { %664 = vmatpush3.msra.mxu1 %v130_v7  ;;  %665 = vmatprep.mubr.msk.f32.mxu1 %vm786_vm0, %v785_v0 }
  0x3e   :  { %681 = vmatmul.mubr.f32.vlgmr.msra.gmra.mrb[0].mxu0 %v118_v6 }
  0x42   :  { %666 = vmatmul.mubr.f32.vlgmr.msra.gmra.mrb[0].mxu1 %v119_v8 }
 0x111   :  { %v494_v15 = vpop.f32.mrb[0].mxu0 }
 0x112   :  { %v682_v16 = vpop.f32.mrb[1].mxu0 }
 0x115   :  { %v274_v17 = vpop.f32.mrb[0].mxu1 }
 0x116   :  { %v683_v19 = vadd.f32 %v494_v15, %v274_v17  ;;  %v667_v20 = vpop.f32.mrb[1].mxu1 }
 0x118   :  { %v505_v22 = vmul.f32 %v683_v19, %v635_v18 }
 0x11a   :  { %v855_v23 = vadd.f32 %v636_v21, %v505_v22 }
 0x11c   :  { %v517_v24 = vand.u32 2139095040, %v855_v23  ;;  %v514_v28 = vand.u32 2147483647, %v855_v23  ;;  %vm516_vm10 = vcmp.lt.s32.totalorder %v855_v23, 0  ;;  %vm606_vm15 = vweird.f32 %v855_v23 }
 0x11e   :  { %v518_v25 = vshrl.u32 %v517_v24, 23  ;;  %v521_v32 = vand.u32 8388607, %v514_v28  ;;  %vm515_vm11 = vcmp.le.f32.partialorder %v514_v28, 0.7853982 }
 0x120   :  { %v637_v26 = vadd.s32 4294967169, %v518_v25  ;;  %v522_v50 = vor.u32 8388608, %v521_v32 }
 0x122   :  { %v524_v27 = vadd.s32 1, %v637_v26  ;;  %v562_v0 = vshll.u32 %v522_v50, 8 }
 0x124   :  { %vm525_vm3 = vcmp.gt.s32.totalorder %v524_v27, 0 }
 0x125   :  { %v526_v29 = vsel %vm525_vm3, %v524_v27, 0 }
 0x126   :  { %v528_v30 = vand.u32 31, %v526_v29  ;;  %v527_v33 = vshrl.u32 %v526_v29, 5 }
 0x128   :  { %v529_v31 = vsub.s32 32, %v528_v30  ;;  %v531_v35 = vshll.u32 %v787_v34, %v528_v30  ;;  %v534_v37 = vshll.u32 %v788_v36, %v528_v30  ;;  %v537_v41 = vshll.u32 %v789_v39, %v528_v30 }
 0x129   :  { %v540_v44 = vshll.u32 %v790_v42, %v528_v30  ;;  %v543_v47 = vshll.u32 %v791_v45, %v528_v30  ;;  %vm546_vm4 = vcmp.lt.s32.totalorder %v527_v33, 1  ;;  %vm549_vm5 = vcmp.lt.s32.totalorder %v527_v33, 4 }
 0x12a   :  { %v532_v38 = vshrl.u32 %v788_v36, %v529_v31  ;;  %v535_v40 = vshrl.u32 %v789_v39, %v529_v31  ;;  %v538_v43 = vshrl.u32 %v790_v42, %v529_v31  ;;  %v541_v46 = vshrl.u32 %v791_v45, %v529_v31 }
 0x12b   :  { %v544_v49 = vshrl.u32 %v792_v48, %v529_v31  ;;  %v530_v59 = vshrl.u32 %v787_v34, %v529_v31  ;;  %vm548_vm6 = vcmp.lt.s32.totalorder %v527_v33, 3  ;;  %vm547_vm7 = vcmp.lt.s32.totalorder %v527_v33, 2 }
 0x12c   :  { %v533_v51 = vor.u32 %v532_v38, %v531_v35  ;;  %v536_v52 = vor.u32 %v535_v40, %v534_v37  ;;  %v539_v53 = vor.u32 %v538_v43, %v537_v41  ;;  %v542_v54 = vor.u32 %v541_v46, %v540_v44 }
 0x12d   :  { %v545_v55 = vor.u32 %v544_v49, %v543_v47 }
 0x12e   :  { %v551_v56 = vsel %vm549_vm5, %v539_v53, 2102212464  ;;  %v554_v57 = vsel %vm546_vm4, %v533_v51, %v536_v52  ;;  %v558_v58 = vsel %vm546_vm4, %v536_v52, %v539_v53  ;;  %v555_v60 = vsel %vm549_vm5, %v542_v54, 920167782 }
 0x12f   :  { %v559_v61 = vsel %vm549_vm5, %v545_v55, 1326507024  ;;  %v556_v62 = vsel %vm548_vm6, %v539_v53, %v555_v60  ;;  %v550_v1 = vsel %vm546_vm4, %v530_v59, %v533_v51  ;;  %v552_v2 = vsel %vm548_vm6, %v536_v52, %v551_v56 }
 0x130   :  { %v560_v63 = vsel %vm548_vm6, %v542_v54, %v559_v61  ;;  %v557_v3 = vsel %vm547_vm7, %v554_v57, %v556_v62  ;;  %v553_v9 = vsel %vm547_vm7, %v550_v1, %v552_v2 }
 0x131   :  { %v561_v4 = vsel %vm547_vm7, %v558_v58, %v560_v63  ;;  %v864_v7 = vmul.u32.u64.low %v562_v0, %v557_v3  ;;  %v865_v8 = vmul.u32.u64.high %v562_v0, %v557_v3, %v864_v7  ;;  %v569_v11 = vmul.u32 %v562_v0, %v553_v9 }
 0x132   :  { %v861_v5 = vmul.u32.u64.low %v562_v0, %v561_v4  ;;  %v862_v6 = vmul.u32.u64.high %v562_v0, %v561_v4, %v861_v5 }
 0x133   :  { %v572_v10 = vadd.s32 1, %v865_v8 }
 0x134   :  { %vm571_vm8 = vc.u32 %v862_v6, %v864_v7  ;;  %v570_v24 = vadd.s32 %v864_v7, %v862_v6 }
 0x135   :  { %v573_v12 = vsel %vm571_vm8, %v572_v10, %v865_v8 }
 0x136   :  { %v574_v13 = vadd.s32 %v573_v12, %v569_v11 }
 0x138   :  { %v575_v14 = vadd.s32 536870912, %v574_v13 }
 0x13a   :  { %v576_v15 = vshrl.u32 %v575_v14, 30 }
 0x13c   :  { %v577_v16 = vshll.u32 %v576_v15, 30  ;;  %v600_v37 = vsub.s32 4, %v576_v15 }
 0x13e   :  { %v578_v17 = vsub.s32 %v574_v13, %v577_v16  ;;  %v601_v40 = vsel %vm516_vm10, %v600_v37, %v576_v15 }
 0x13f   :  { %v603_v42 = vsel %vm515_vm11, 0, %v601_v40 }
 0x140   :  { %v580_v18 = vsub.s32 0, %v578_v17  ;;  %v607_v43 = vadd.s32 3, %v603_v42 }
 0x142   :  { %v638_v19 = vmin.u32 %v580_v18, %v578_v17  ;;  %v608_v44 = vand.u32 3, %v607_v43 }
 0x144   :  { %v582_v20 = vclz %v638_v19  ;;  %vm613_vm12 = vcmp.eq.s32.totalorder %v608_v44, 2  ;;  %vm610_vm13 = vcmp.eq.s32.totalorder %v608_v44, 0  ;;  %vm609_vm14 = vcmp.lt.s32.totalorder %v608_v44, 2 }
 0x146   :  { %v639_v21 = vadd.s32 4294967294, %v582_v20 }
 0x148   :  { %vm640_vm9 = vcmp.lt.s32.totalorder %v639_v21, 0 }
 0x149   :  { %v585_v22 = vsel %vm640_vm9, 0, %v639_v21 }
 0x14a   :  { %v586_v25 = vsub.s32 32, %v585_v22  ;;  %v590_v26 = vsub.s32 4294967266, %v585_v22  ;;  %v587_v27 = vshll.u32 %v578_v17, %v585_v22 }
 0x14c   :  { %v588_v29 = vshrl.u32 %v570_v24, %v586_v25  ;;  %v591_v30 = vadd.s32 127, %v590_v26 }
 0x14e   :  { %v589_v31 = vor.u32 %v588_v29, %v587_v27  ;;  %v592_v32 = vshll.u32 %v591_v30, 23 }
 0x150   :  { %v593_v33 = vor.u32 4788187, %v592_v32  ;;  %v596_v35 = vcvt.s32.f32 %v589_v31 }
 0x152   :  { %v594_v34 = vand.u32 2147483647, %v593_v33 }
 0x154   :  { %v597_v36 = vmul.f32 %v596_v35, %v594_v34 }
 0x156   :  { %v598_v38 = vxor.u32 2147483648, %v597_v36 }
 0x158   :  { %v599_v39 = vsel %vm516_vm10, %v598_v38, %v597_v36 }
 0x159   :  { %v602_v41 = vsel %vm515_vm11, %v855_v23, %v599_v39 }
 0x15a   :  { %707 = vcosq.f32 %v602_v41 }
 0x15b   :  { %709 = vsinq.f32 %v602_v41 }
 0x164   :  { %v708_v45 = vpop.eup %707 }
 0x165   :  { %v710_v46 = vpop.eup %709  ;;  %v614_v47 = vxor.u32 2147483648, %v708_v45 }
 0x166   :  { %v611_v48 = vxor.u32 2147483648, %v710_v46 }
 0x167   :  { %v615_v49 = vsel %vm613_vm12, %v614_v47, %v710_v46 }
 0x168   :  { %v612_v28 = vsel %vm610_vm13, %v708_v45, %v611_v48 }
 0x169   :  { %v616_v50 = vsel %vm609_vm14, %v612_v28, %v615_v49 }
 0x16a   :  { %v617_v51 = vsel %vm606_vm15, nan, %v616_v50 }
 0x16b   :  { %618 = vst [vmem:[#allocation7] sm:$0x3] %v617_v51 }
 0x16c   :  { %766 = shalt.err (!%p763_p6)
}
 0x16d   :  { %s767_s18 = scalar_lea.hbm %s892_s4, 32 }
 0x16e   :  { %p768_p7 = scmp.ne.s32.totalorder %s892_s4, %s767_s18  ;;  %p771_p8 = scmp.lt.u32.totalorder %s767_s18, %s892_s4 }
 0x170   :  { %p773_p9 = pnand %p771_p8, %p768_p7 }
 0x172   :  { %776 = shalt.err (!%p773_p9)
}
 0x173   :  { %628 = dma.vmem_to_hbm [thread:$0]  %s626_s3, 32, %s892_s4, [#allocation4]  }
 0x174   :  { %781 = dma.done.wait [#allocation4], 32  }
 0x175   :  { %782 = vsyncadd [#allocation4], 4294967264 }
 0x176   :  { %632 = vsyncpa [#allocation3], 1 }
 0x177   :  { %633 = vsyncpa [#allocation6], 1 }
 0x178   :  { %634 = vsyncpa [#allocation4], 1 }

</bundles_post_ra>
